<compile_context>
chip_gen: v6e
topology: v6e:2x2x1
jax: 0.10.0
libtpu: 0.0.40
codegen_flags: <defaults>
</compile_context>

<pallas_src>
import math

import jax
import jax.numpy as jnp
from jax.experimental import pallas as pl
from jax.experimental.pallas import tpu as pltpu


def _round_up(n, m):
    return ((n + m - 1) // m) * m


_SQRT_HALF = 0.7071067811865476
_SQRT_2_OVER_PI = 0.7978845608028654


def _gelu(h, approximate):
    if approximate:
        # tanh-approx GELU: cubic on the VALU, tanh on the (otherwise idle) EUP.
        inner = _SQRT_2_OVER_PI * (h + 0.044715 * (h * h * h))
        return 0.5 * h * (1.0 + jnp.tanh(inner))
    # Exact erf GELU (matches torch.nn.functional.gelu default).
    return 0.5 * h * (1.0 + jax.lax.erf(h * _SQRT_HALF))


def _make_ffn_kernel(n_sub, sub_ff, approximate, gelu_dtype):
    def _ffn_kernel(x_ref, w1_ref, b1_ref, w2_ref, b2_ref, o_ref, acc_ref):
        # x_ref:   (tile_m, d_model_p)   compute dtype
        # w1_ref:  (d_model_p, tile_ff)  compute dtype
        # b1_ref:  (1, tile_ff)          f32
        # w2_ref:  (tile_ff, d_model_p)  compute dtype
        # b2_ref:  (1, d_model_p)        f32
        # o_ref:   (tile_m, d_model_p)   output dtype
        # acc_ref: (tile_m, d_model_p)   f32 accumulator (resident across k)
        k = pl.program_id(1)

        @pl.when(k == 0)
        def _():
            acc_ref[...] = jnp.zeros_like(acc_ref)

        x = x_ref[...]  # load once, reused by every sub-chunk
        for j in range(n_sub):  # static unroll: lets matmul1(j+1) overlap GELU(j)
            lo = j * sub_ff
            h = jnp.dot(x, w1_ref[:, lo:lo + sub_ff],
                        preferred_element_type=jnp.float32)
            h = h + b1_ref[:, lo:lo + sub_ff]
            h = _gelu(h.astype(gelu_dtype), approximate)
            acc_ref[...] += jnp.dot(h.astype(w2_ref.dtype),
                                    w2_ref[lo:lo + sub_ff, :],
                                    preferred_element_type=jnp.float32)

        @pl.when(k == pl.num_programs(1) - 1)
        def _():
            o_ref[...] = (acc_ref[...] + b2_ref[...]).astype(o_ref.dtype)

    return _ffn_kernel


def prepare_ffn_weights(w1, b1, w2, b2, *, tile_ff=1024,
                        compute_dtype=jnp.bfloat16):
    """Hoist transpose/pad/cast of the FFN weights out of the per-call path.

    PyTorch nn.Linear layout: w1 [d_ff, d_model], b1 [d_ff],
    w2 [d_model, d_ff], b2 [d_model].  Call once per layer and reuse.
    """
    d_ff, d_model = w1.shape
    d_model_p = _round_up(d_model, 128)
    tile_ff = _round_up(min(tile_ff, _round_up(d_ff, 128)), 128)
    d_ff_p = _round_up(d_ff, tile_ff)

    w1_t = jnp.pad(w1.T.astype(compute_dtype),
                   ((0, d_model_p - d_model), (0, d_ff_p - d_ff)))
    w2_t = jnp.pad(w2.T.astype(compute_dtype),
                   ((0, d_ff_p - d_ff), (0, d_model_p - d_model)))
    b1_2d = jnp.pad(b1.astype(jnp.float32).reshape(1, d_ff),
                    ((0, 0), (0, d_ff_p - d_ff)))
    b2_2d = jnp.pad(b2.astype(jnp.float32).reshape(1, d_model),
                    ((0, 0), (0, d_model_p - d_model)))
    return dict(w1_t=w1_t, b1=b1_2d, w2_t=w2_t, b2=b2_2d,
                d_model=d_model, d_ff=d_ff, d_model_p=d_model_p,
                d_ff_p=d_ff_p, tile_ff=tile_ff, compute_dtype=compute_dtype)


def poswise_ffn_prepared(x, params, *, tile_m=1024, gelu_approximate=False,
                         gelu_dtype=None, ensure_two_row_blocks=True):
    """x: [B, S, d_model]; params from prepare_ffn_weights()."""
    B, S, d_model = x.shape
    assert d_model == params["d_model"], "d_model mismatch with prepared weights"
    compute_dtype = params["compute_dtype"]
    out_dtype = x.dtype
    d_model_p = params["d_model_p"]
    d_ff = params["d_ff"]
    d_ff_p = params["d_ff_p"]
    tile_ff = params["tile_ff"]
    w1_t, b1_2d = params["w1_t"], params["b1"]
    w2_t, b2_2d = params["w2_t"], params["b2"]

    # GELU dtype: exact erf stays in f32 (v5e-safe, bit-close to PyTorch);
    # tanh-approx runs in the compute dtype (bf16 VALU/EUP on v6e/v7x).
    if gelu_dtype is None:
        gelu_dtype = compute_dtype if gelu_approximate else jnp.float32

    M = B * S
    c_item = jnp.dtype(compute_dtype).itemsize
    o_item = jnp.dtype(out_dtype).itemsize
    sub_mult = 16 if c_item == 2 else 8     # packed-sublane alignment for bf16

    # ---- row-tile selection -------------------------------------------------
    m_aligned = _round_up(M, sub_mult)
    tm = min(_round_up(tile_m, sub_mult), m_aligned)
    if (ensure_two_row_blocks and pl.cdiv(m_aligned, tm) == 1
            and m_aligned >= 512):
        # keep grid[0] >= 2 so both v7x TensorCores get work (each block >= 256)
        tm = _round_up(pl.cdiv(m_aligned, 2), sub_mult)

    # d_ff sub-chunks inside one k step (MXU/VPU overlap); lanes stay /128.
    n_sub = 2 if (tile_ff % 256 == 0 and tile_ff >= 256) else 1
    sub_ff = tile_ff // n_sub

    # ---- VMEM budget (double-buffered tiles + scratch + h temps) ------------
    def _vmem_est(tm_):
        return (2 * tm_ * d_model_p * c_item          # x tile
                + 2 * d_model_p * tile_ff * c_item    # w1 tile
                + 2 * tile_ff * d_model_p * c_item    # w2 tile
                + 2 * 8 * tile_ff * 4                 # b1 (sublane-padded)
                + 2 * 8 * d_model_p * 4               # b2
                + 2 * tm_ * d_model_p * o_item        # out tile
                + tm_ * d_model_p * 4                 # f32 accumulator scratch
                + tm_ * sub_ff * (4 + c_item))        # h temp (f32 + cast copy)

    while _vmem_est(tm) > (44 << 20) and tm > 256:
        tm = max(256, _round_up(tm // 2, sub_mult))
    vmem_limit = min(max(int(_vmem_est(tm) * 1.25) + (2 << 20), 8 << 20),
                     64 << 20)   # never request more than v7x's physical VMEM

    m_p = _round_up(M, tm)
    grid = (m_p // tm, d_ff_p // tile_ff)

    # ---- activations: cast and pad only if needed ----------------------------
    x2d = x.reshape(M, d_model).astype(compute_dtype)
    if m_p != M or d_model_p != d_model:
        x2d = jnp.pad(x2d, ((0, m_p - M), (0, d_model_p - d_model)))

    # ---- cost estimate (includes per-row-tile weight re-reads) ---------------
    cost = pl.CostEstimate(
        flops=4 * M * d_model * d_ff,          # two matmuls (2 flops/MAC each)
        transcendentals=M * d_ff,              # erf / tanh
        bytes_accessed=(x2d.size * c_item
                        + grid[0] * (w1_t.size + w2_t.size) * c_item
                        + grid[0] * (b1_2d.size + b2_2d.size) * 4
                        + m_p * d_model_p * o_item),
    )

    kernel = _make_ffn_kernel(n_sub, sub_ff, gelu_approximate, gelu_dtype)

    # TODO(synk): for very small M (grid[0]==1 on v6e) the weight DMA is exposed;
    # pipeline_mode=pl.Buffered(3) on the w1/w2 specs would deepen prefetch.
    out2d = pl.pallas_call(
        kernel,
        out_shape=jax.ShapeDtypeStruct((m_p, d_model_p), out_dtype),
        grid_spec=pltpu.PrefetchScalarGridSpec(
            num_scalar_prefetch=0,
            grid=grid,
            in_specs=[
                pl.BlockSpec((tm, d_model_p), lambda i, k: (i, 0)),
                pl.BlockSpec((d_model_p, tile_ff), lambda i, k: (0, k)),
                pl.BlockSpec((1, tile_ff), lambda i, k: (0, k)),
                pl.BlockSpec((tile_ff, d_model_p), lambda i, k: (k, 0)),
                pl.BlockSpec((1, d_model_p), lambda i, k: (0, 0)),
            ],
            out_specs=pl.BlockSpec((tm, d_model_p), lambda i, k: (i, 0)),
            scratch_shapes=[pltpu.VMEM((tm, d_model_p), jnp.float32)],
        ),
        compiler_params=pltpu.CompilerParams(
            dimension_semantics=("parallel", "arbitrary"),
            vmem_limit_bytes=vmem_limit,
        ),
        cost_estimate=cost,
    )(x2d, w1_t, b1_2d, w2_t, b2_2d)

    return out2d[:M, :d_model].reshape(B, S, d_model)


def poswise_ffn(x, w1, b1, w2, b2, *, tile_m=1024, tile_ff=1024,
                compute_dtype=jnp.bfloat16, **kwargs):
    """Convenience one-shot wrapper (prepares weights inline). For per-layer
    invocation inside a model, call prepare_ffn_weights() once and reuse."""
    if compute_dtype is None:
        compute_dtype = x.dtype
    params = prepare_ffn_weights(w1, b1, w2, b2, tile_ff=tile_ff,
                                 compute_dtype=compute_dtype)
    return poswise_ffn_prepared(x, params, tile_m=tile_m, **kwargs)


if __name__ == "__main__":
    # Small shapes consistent with the module's FFN forward: [batch, seq, d_model]
    B, S, d_model, d_ff = 2, 8, 32, 64

    key = jax.random.PRNGKey(0)
    kx, kw1, kb1, kw2, kb2 = jax.random.split(key, 5)

    x = jax.random.normal(kx, (B, S, d_model), dtype=jnp.float32)
    # nn.Linear layout: weight [out, in], bias [out]
    lim1 = 1.0 / math.sqrt(d_model)
    lim2 = 1.0 / math.sqrt(d_ff)
    w1 = jax.random.uniform(kw1, (d_ff, d_model), jnp.float32, -lim1, lim1)
    b1 = jax.random.uniform(kb1, (d_ff,), jnp.float32, -lim1, lim1)
    w2 = jax.random.uniform(kw2, (d_model, d_ff), jnp.float32, -lim2, lim2)
    b2 = jax.random.uniform(kb2, (d_model,), jnp.float32, -lim2, lim2)

    # Pure-JAX references
    h_ref = x @ w1.T + b1
    ref_exact = jax.nn.gelu(h_ref, approximate=False) @ w2.T + b2
    ref_tanh = jax.nn.gelu(h_ref, approximate=True) @ w2.T + b2

    # 1) f32 compute path, exact erf GELU: strict tolerance
    out_f32 = poswise_ffn(x, w1, b1, w2, b2, compute_dtype=jnp.float32)
    jax.block_until_ready(out_f32)
    assert out_f32.shape == (B, S, d_model)
    assert jnp.allclose(out_f32, ref_exact, atol=1e-5, rtol=1e-5)

    # 2) default perf path: bf16 MXU operands, pre-prepared weights, exact GELU
    params_bf16 = prepare_ffn_weights(w1, b1, w2, b2)   # hoisted once per layer
    out_bf16 = poswise_ffn_prepared(x, params_bf16)
    jax.block_until_ready(out_bf16)
    assert out_bf16.shape == (B, S, d_model)
    assert jnp.allclose(out_bf16, ref_exact, atol=5e-2, rtol=5e-2)

    # 3) tanh-approx GELU path (EUP transcendental, bf16 VALU on v6e/v7x)
    out_tanh = poswise_ffn_prepared(x, params_bf16, gelu_approximate=True)
    jax.block_until_ready(out_tanh)
    assert out_tanh.shape == (B, S, d_model)
    assert jnp.allclose(out_tanh, ref_tanh, atol=5e-2, rtol=5e-2)

    print("KERNEL_OK")
</pallas_src>

<mosaic_0001>
module attributes {stable_mosaic.version = 11 : i64} {
  func.func @_ffn_kernel(%arg0: i32, %arg1: i32, %arg2: memref<16x128xf32, #tpu.memory_space<vmem>>, %arg3: memref<128x128xf32, #tpu.memory_space<vmem>>, %arg4: memref<1x128xf32, #tpu.memory_space<vmem>>, %arg5: memref<128x128xf32, #tpu.memory_space<vmem>>, %arg6: memref<1x128xf32, #tpu.memory_space<vmem>>, %arg7: memref<16x128xf32, #tpu.memory_space<vmem>>, %arg8: memref<16x128xf32, #tpu.memory_space<vmem>>) attributes {dimension_semantics = [#tpu.dimension_semantics<parallel>, #tpu.dimension_semantics<arbitrary>], iteration_bounds = array<i64: 1, 1>, scalar_prefetch = 0 : i64, scratch_operands = 1 : i64, tpu.core_type = #tpu.core_type<tc>, window_params = [{transform_indices = @transform_0, window_bounds = array<i64: 16, 128>}, {transform_indices = @transform_1, window_bounds = array<i64: 128, 128>}, {transform_indices = @transform_2, window_bounds = array<i64: 1, 128>}, {transform_indices = @transform_3, window_bounds = array<i64: 128, 128>}, {pipeline_mode = #tpu.pipeline_mode<synchronous>, transform_indices = @transform_4, window_bounds = array<i64: 1, 128>}, {transform_indices = @transform_5, window_bounds = array<i64: 16, 128>}]} {
    %c0_i32 = arith.constant 0 : i32
    %0 = arith.cmpi eq, %arg1, %c0_i32 : i32
    %1 = arith.extui %0 : i1 to i32
    %c0_i32_0 = arith.constant 0 : i32
    %2 = arith.cmpi ne, %1, %c0_i32_0 : i32
    scf.if %2 {
      %cst_18 = arith.constant 0.000000e+00 : f32
      %25 = vector.broadcast %cst_18 : f32 to vector<16x128xf32>
      %c0_19 = arith.constant 0 : index
      %c0_20 = arith.constant 0 : index
      %26 = vector.load %arg8[%c0_19, %c0_20] : memref<16x128xf32, #tpu.memory_space<vmem>>, vector<16x128xf32>
      tpu.vector_store %arg8[%c0_19, %c0_20], %25 {strides = array<i32>} : memref<16x128xf32, #tpu.memory_space<vmem>>, vector<16x128xf32>,
    } else {
    }
    %c0 = arith.constant 0 : index
    %c0_1 = arith.constant 0 : index
    %3 = vector.load %arg2[%c0, %c0_1] : memref<16x128xf32, #tpu.memory_space<vmem>>, vector<16x128xf32>
    %c0_2 = arith.constant 0 : index
    %c0_3 = arith.constant 0 : index
    %4 = vector.load %arg3[%c0_2, %c0_3] : memref<128x128xf32, #tpu.memory_space<vmem>>, vector<128x128xf32>
    %cst = arith.constant dense<0.000000e+00> : vector<16x128xf32>
    %5 = tpu.matmul %3, %4, %cst {dimension_numbers = #tpu.dot_dimension_numbers<[1], [0], [0], [1], [0, 0, 1, 1], [], []>} : vector<16x128xf32>, vector<128x128xf32>, vector<16x128xf32> -> vector<16x128xf32>
    %c0_4 = arith.constant 0 : index
    %c0_5 = arith.constant 0 : index
    %6 = vector.load %arg4[%c0_4, %c0_5] : memref<1x128xf32, #tpu.memory_space<vmem>>, vector<1x128xf32>
    %7 = vector.broadcast %6 : vector<1x128xf32> to vector<16x128xf32>
    %8 = arith.addf %5, %7 : vector<16x128xf32>
    %cst_6 = arith.constant 5.000000e-01 : f32
    %9 = vector.broadcast %cst_6 : f32 to vector<16x128xf32>
    %10 = arith.mulf %9, %8 : vector<16x128xf32>
    %cst_7 = arith.constant 0.707106769 : f32
    %11 = vector.broadcast %cst_7 : f32 to vector<16x128xf32>
    %12 = arith.mulf %8, %11 : vector<16x128xf32>
    %13 = math.erf %12 : vector<16x128xf32>
    %cst_8 = arith.constant 1.000000e+00 : f32
    %14 = vector.broadcast %cst_8 : f32 to vector<16x128xf32>
    %15 = arith.addf %14, %13 : vector<16x128xf32>
    %16 = arith.mulf %10, %15 : vector<16x128xf32>
    %c0_9 = arith.constant 0 : index
    %c0_10 = arith.constant 0 : index
    %17 = vector.load %arg8[%c0_9, %c0_10] : memref<16x128xf32, #tpu.memory_space<vmem>>, vector<16x128xf32>
    %c0_11 = arith.constant 0 : index
    %c0_12 = arith.constant 0 : index
    %18 = vector.load %arg5[%c0_11, %c0_12] : memref<128x128xf32, #tpu.memory_space<vmem>>, vector<128x128xf32>
    %cst_13 = arith.constant dense<0.000000e+00> : vector<16x128xf32>
    %19 = tpu.matmul %16, %18, %cst_13 {dimension_numbers = #tpu.dot_dimension_numbers<[1], [0], [0], [1], [0, 0, 1, 1], [], []>} : vector<16x128xf32>, vector<128x128xf32>, vector<16x128xf32> -> vector<16x128xf32>
    %20 = arith.addf %17, %19 : vector<16x128xf32>
    %c0_14 = arith.constant 0 : index
    %c0_15 = arith.constant 0 : index
    %21 = vector.load %arg8[%c0_14, %c0_15] : memref<16x128xf32, #tpu.memory_space<vmem>>, vector<16x128xf32>
    tpu.vector_store %arg8[%c0_14, %c0_15], %20 {strides = array<i32>} : memref<16x128xf32, #tpu.memory_space<vmem>>, vector<16x128xf32>,
    %c0_i32_16 = arith.constant 0 : i32
    %22 = arith.cmpi eq, %arg1, %c0_i32_16 : i32
    %23 = arith.extui %22 : i1 to i32
    %c0_i32_17 = arith.constant 0 : i32
    %24 = arith.cmpi ne, %23, %c0_i32_17 : i32
    scf.if %24 {
      %c0_18 = arith.constant 0 : index
      %c0_19 = arith.constant 0 : index
      %25 = vector.load %arg8[%c0_18, %c0_19] : memref<16x128xf32, #tpu.memory_space<vmem>>, vector<16x128xf32>
      %c0_20 = arith.constant 0 : index
      %c0_21 = arith.constant 0 : index
      %26 = vector.load %arg6[%c0_20, %c0_21] : memref<1x128xf32, #tpu.memory_space<vmem>>, vector<1x128xf32>
      %27 = vector.broadcast %26 : vector<1x128xf32> to vector<16x128xf32>
      %28 = arith.addf %25, %27 : vector<16x128xf32>
      %c0_22 = arith.constant 0 : index
      %c0_23 = arith.constant 0 : index
      %29 = vector.load %arg7[%c0_22, %c0_23] : memref<16x128xf32, #tpu.memory_space<vmem>>, vector<16x128xf32>
      tpu.vector_store %arg7[%c0_22, %c0_23], %28 {strides = array<i32>} : memref<16x128xf32, #tpu.memory_space<vmem>>, vector<16x128xf32>,
    } else {
    }
    return
  }
  func.func @transform_0(%arg0: i32, %arg1: i32) -> (i32, i32) {
    %c0_i32 = arith.constant 0 : i32
    %c0_i32_0 = arith.constant 0 : i32
    return %arg0, %c0_i32 : i32, i32
  }
  func.func @transform_1(%arg0: i32, %arg1: i32) -> (i32, i32) {
    %c0_i32 = arith.constant 0 : i32
    %c0_i32_0 = arith.constant 0 : i32
    return %c0_i32, %arg1 : i32, i32
  }
  func.func @transform_2(%arg0: i32, %arg1: i32) -> (i32, i32) {
    %c0_i32 = arith.constant 0 : i32
    %c0_i32_0 = arith.constant 0 : i32
    return %c0_i32, %arg1 : i32, i32
  }
  func.func @transform_3(%arg0: i32, %arg1: i32) -> (i32, i32) {
    %c0_i32 = arith.constant 0 : i32
    %c0_i32_0 = arith.constant 0 : i32
    return %arg1, %c0_i32 : i32, i32
  }
  func.func @transform_4(%arg0: i32, %arg1: i32) -> (i32, i32) {
    %c0_i32 = arith.constant 0 : i32
    %c0_i32_0 = arith.constant 0 : i32
    %c0_i32_1 = arith.constant 0 : i32
    return %c0_i32, %c0_i32_0 : i32, i32
  }
  func.func @transform_5(%arg0: i32, %arg1: i32) -> (i32, i32) {
    %c0_i32 = arith.constant 0 : i32
    %c0_i32_0 = arith.constant 0 : i32
    return %arg0, %c0_i32 : i32, i32
  }
}

</mosaic_0001>

<bundles_post_ra>
// kernel: tpu_custom_call.1
= control target key start
LH: loop header
LB: loop body
LE: loop exit
PB: predicated region body
PF: predicated region fallthrough
CT: control target
= control target key end

     0   :  { %10 = vsyncpa [#allocation4], 0  ;;  %s579_s0 = inlined_call_operand.hbm [shape: f32[16,128], index: 0, kind: input, shape index: {}]   ;;  %s580_s1 = inlined_call_operand.hbm [shape: f32[128,128], index: 1, kind: input, shape index: {}]   ;;  %s581_s2 = inlined_call_operand.vmem [shape: f32[1,128], index: 2, kind: input, shape index: {}]   ;;  %s582_s3 = inlined_call_operand.hbm [shape: f32[128,128], index: 3, kind: input, shape index: {}]   ;;  %s583_s4 = inlined_call_operand.vmem [shape: f32[1,128], index: 4, kind: input, shape index: {}]   ;;  %s584_s5 = inlined_call_operand.hbm [shape: f32[16,128], index: 5, kind: output, shape index: {}]  }
   0x1   :  { %11 = vsyncpa [#allocation7], 0 }
   0x2   :  { %12 = vsyncpa [#allocation5], 0  ;;  %s513_s18 = smov [#allocation6]   ;;  %s514_s20 = smov [#allocation3]  }
   0x3   :  { %s30_s19 = sshll.u32 %s513_s18, 4  ;;  %s18_s21 = sshll.u32 %s514_s20, 4  ;;  %s31_s19 = int_to_ptr.vmem [resolvable:$true] %s30_s19  ;;  %s19_s21 = int_to_ptr.vmem [resolvable:$true] %s18_s21 }
   0x4   :  { %s435_s22 = scalar_lea.vmem %s31_s19, 2048  ;;  %p440_p1 = scmp.lt.s32.totalorder %s31_s19, %s31_s19 }
   0x5   :  { %p436_p0 = scmp.ne.s32.totalorder %s31_s19, %s435_s22  ;;  %p441_p2 = scmp.lt.s32.totalorder %s435_s22, %s435_s22 }
   0x7   :  { %p442_p3 = por %p441_p2, %p440_p1 }
   0x9   :  { %p443_p4 = pnand %p442_p3, %p436_p0 }
   0xb   :  { %446 = shalt.err (!%p443_p4)
}
   0xc   :  { %s515_s23 = smov 128   ;;  %s516_s24 = smov 8  }
   0xd   :  { %36 = dma.hbm_to_vmem [thread:$0]  %s580_s1, 2048, %s31_s19, [#allocation7], %s515_s23, %s515_s23, %s516_s24  }
   0xe   :  { %s455_s27 = scalar_lea.vmem %s19_s21, 256  ;;  %p460_p6 = scmp.lt.s32.totalorder %s19_s21, %s19_s21 }
   0xf   :  { %p456_p5 = scmp.ne.s32.totalorder %s19_s21, %s455_s27  ;;  %p461_p7 = scmp.lt.s32.totalorder %s455_s27, %s455_s27 }
  0x11   :  { %p462_p8 = por %p461_p7, %p460_p6 }
  0x13   :  { %p463_p9 = pnand %p462_p8, %p456_p5 }
  0x15   :  { %466 = shalt.err (!%p463_p9)
}
  0x16   :  { %24 = dma.hbm_to_vmem [thread:$0]  %s579_s0, 256, %s19_s21, [#allocation4], %s515_s23, %s515_s23, %s516_s24  }
  0x17   :  { %s517_s30 = smov [#allocation8]  }
  0x18   :  { %s44_s6 = sshll.u32 %s517_s30, 4  ;;  %s45_s6 = int_to_ptr.vmem [resolvable:$true] %s44_s6 }
  0x19   :  { %s475_s7 = scalar_lea.vmem %s45_s6, 2048  ;;  %p480_p11 = scmp.lt.s32.totalorder %s45_s6, %s45_s6 }
  0x1a   :  { %p476_p10 = scmp.ne.s32.totalorder %s45_s6, %s475_s7  ;;  %p481_p12 = scmp.lt.s32.totalorder %s475_s7, %s475_s7 }
  0x1c   :  { %p482_p13 = por %p481_p12, %p480_p11 }
  0x1e   :  { %p483_p0 = pnand %p482_p13, %p476_p10 }
  0x20   :  { %486 = shalt.err (!%p483_p0)
}
  0x21   :  { %50 = dma.hbm_to_vmem [thread:$0]  %s582_s3, 2048, %s45_s6, [#allocation7], %s515_s23, %s515_s23, %s516_s24  }
  0x22   :  { %507 = dma.done.wait [#allocation4], 256  }
  0x23   :  { %508 = vsyncadd [#allocation4], 4294967040 }
  0x24   :  { %509 = dma.done.wait [#allocation7], 4096  }
  0x25   :  { %510 = vsyncadd [#allocation7], 4294963200  ;;  %v85_v0 = vld [vmem:[#allocation6 + $0x78] sm:$0xff]  ;;  %v84_v1 = vld [vmem:[#allocation6 + $0x70] sm:$0xff]  ;;  %s518_s10 = smov [#allocation9]  }
  0x26   :  { %347 = vmatprep.subr.mxu0 %v85_v0  ;;  %v83_v2 = vld [vmem:[#allocation6 + $0x68] sm:$0xff]  ;;  %v82_v3 = vld [vmem:[#allocation6 + $0x60] sm:$0xff]  ;;  %v68_v4 = vld [vmem:[#allocation3] sm:$0xff]  ;;  %s296_s11 = sshll.u32 %s518_s10, 4  ;;  %s297_s11 = int_to_ptr.vmem [resolvable:$true] %s296_s11 }
  0x27   :  { %348 = vmatpush3.msra.mxu0 %v85_v0  ;;  %v81_v5 = vld [vmem:[#allocation6 + $0x58] sm:$0xff]  ;;  %379 = vmatprep.mubr.f32.mxu0 %v68_v4  ;;  %v194_v7 = vld [vmem:[#allocation8 + $0x70] sm:$0xff]  ;;  %v193_v9 = vld [vmem:[#allocation8 + $0x68] sm:$0xff]  ;;  %s487_s12 = scalar_lea.vmem %s297_s11, 256  ;;  %p492_p2 = scmp.lt.s32.totalorder %s297_s11, %s297_s11 }
  0x28   :  { %349 = vmatprep.subr.mxu0 %v84_v1  ;;  %v195_v6 = vld [vmem:[#allocation8 + $0x78] sm:$0xff]  ;;  %v80_v8 = vld [vmem:[#allocation6 + $0x50] sm:$0xff]  ;;  %v79_v10 = vld [vmem:[#allocation6 + $0x48] sm:$0xff]  ;;  %p488_p1 = scmp.ne.s32.totalorder %s297_s11, %s487_s12  ;;  %p493_p3 = scmp.lt.s32.totalorder %s487_s12, %s487_s12 }
  0x29   :  { %350 = vmatpush3.msra.mxu0 %v84_v1  ;;  %382 = vmatprep.subr.mxu1 %v195_v6  ;;  %v78_v11 = vld [vmem:[#allocation6 + $0x40] sm:$0xff]  ;;  %v77_v12 = vld [vmem:[#allocation6 + $0x38] sm:$0xff]  ;;  %v76_v13 = vld [vmem:[#allocation6 + $0x30] sm:$0xff] }
  0x2a   :  { %351 = vmatprep.subr.mxu0 %v83_v2  ;;  %383 = vmatpush3.msra.mxu1 %v195_v6  ;;  %v75_v14 = vld [vmem:[#allocation6 + $0x28] sm:$0xff]  ;;  %v74_v15 = vld [vmem:[#allocation6 + $0x20] sm:$0xff]  ;;  %v73_v16 = vld [vmem:[#allocation6 + $0x18] sm:$0xff]  ;;  %p494_p4 = por %p493_p3, %p492_p2 }
  0x2b   :  { %352 = vmatpush3.msra.mxu0 %v83_v2  ;;  %384 = vmatprep.subr.mxu1 %v194_v7  ;;  %v72_v17 = vld [vmem:[#allocation6 + $0x10] sm:$0xff]  ;;  %v71_v18 = vld [vmem:[#allocation6 + $0x8] sm:$0xff]  ;;  %v70_v19 = vld [vmem:[#allocation6] sm:$0xff] }
  0x2c   :  { %353 = vmatprep.subr.mxu0 %v82_v3  ;;  %385 = vmatpush3.msra.mxu1 %v194_v7  ;;  %v69_v20 = vld [vmem:[#allocation3 + $0x8] sm:$0xff]  ;;  %v192_v21 = vld [vmem:[#allocation8 + $0x60] sm:$0xff]  ;;  %v190_v23 = vld [vmem:[#allocation8 + $0x50] sm:$0xff]  ;;  %p495_p5 = pnand %p494_p4, %p488_p1 }
  0x2d   :  { %354 = vmatpush3.msra.mxu0 %v82_v3  ;;  %386 = vmatprep.subr.mxu1 %v193_v9  ;;  %v191_v22 = vld [vmem:[#allocation8 + $0x58] sm:$0xff]  ;;  %v189_v24 = vld [vmem:[#allocation8 + $0x48] sm:$0xff]  ;;  %v188_v25 = vld [vmem:[#allocation8 + $0x40] sm:$0xff] }
  0x2e   :  { %355 = vmatprep.subr.mxu0 %v81_v5  ;;  %387 = vmatpush3.msra.mxu1 %v193_v9  ;;  %v187_v26 = vld [vmem:[#allocation8 + $0x38] sm:$0xff]  ;;  %v186_v27 = vld [vmem:[#allocation8 + $0x30] sm:$0xff]  ;;  %v185_v28 = vld [vmem:[#allocation8 + $0x28] sm:$0xff] }
  0x2f   :  { %356 = vmatpush3.msra.mxu0 %v81_v5  ;;  %388 = vmatprep.subr.mxu1 %v192_v21  ;;  %v184_v29 = vld [vmem:[#allocation8 + $0x20] sm:$0xff]  ;;  %v183_v30 = vld [vmem:[#allocation8 + $0x18] sm:$0xff]  ;;  %v182_v31 = vld [vmem:[#allocation8 + $0x10] sm:$0xff] }
  0x30   :  { %357 = vmatprep.subr.mxu0 %v80_v8  ;;  %389 = vmatpush3.msra.mxu1 %v192_v21  ;;  %v181_v32 = vld [vmem:[#allocation8 + $0x8] sm:$0xff]  ;;  %v180_v33 = vld [vmem:[#allocation8] sm:$0xff]  ;;  %v309_v34 = vld [vmem:[%s581_s2] ss:$0 sm:$0xff] }
  0x31   :  { %358 = vmatpush3.msra.mxu0 %v80_v8  ;;  %390 = vmatprep.subr.mxu1 %v191_v22  ;;  %v310_v49 = vld [vmem:[%s583_s4] ss:$0 sm:$0xff] }
  0x32   :  { %359 = vmatprep.subr.mxu0 %v79_v10  ;;  %391 = vmatpush3.msra.mxu1 %v191_v22 }
  0x33   :  { %360 = vmatpush3.msra.mxu0 %v79_v10  ;;  %392 = vmatprep.subr.mxu1 %v190_v23 }
  0x34   :  { %361 = vmatprep.subr.mxu0 %v78_v11  ;;  %393 = vmatpush3.msra.mxu1 %v190_v23 }
  0x35   :  { %362 = vmatpush3.msra.mxu0 %v78_v11  ;;  %394 = vmatprep.subr.mxu1 %v189_v24 }
  0x36   :  { %363 = vmatprep.subr.mxu0 %v77_v12  ;;  %395 = vmatpush3.msra.mxu1 %v189_v24 }
  0x37   :  { %364 = vmatpush3.msra.mxu0 %v77_v12  ;;  %396 = vmatprep.subr.mxu1 %v188_v25 }
  0x38   :  { %365 = vmatprep.subr.mxu0 %v76_v13  ;;  %397 = vmatpush3.msra.mxu1 %v188_v25 }
  0x39   :  { %366 = vmatpush3.msra.mxu0 %v76_v13  ;;  %398 = vmatprep.subr.mxu1 %v187_v26 }
  0x3a   :  { %367 = vmatprep.subr.mxu0 %v75_v14  ;;  %399 = vmatpush3.msra.mxu1 %v187_v26 }
  0x3b   :  { %368 = vmatpush3.msra.mxu0 %v75_v14  ;;  %400 = vmatprep.subr.mxu1 %v186_v27 }
  0x3c   :  { %369 = vmatprep.subr.mxu0 %v74_v15  ;;  %401 = vmatpush3.msra.mxu1 %v186_v27 }
  0x3d   :  { %370 = vmatpush3.msra.mxu0 %v74_v15  ;;  %402 = vmatprep.subr.mxu1 %v185_v28 }
  0x3e   :  { %371 = vmatprep.subr.mxu0 %v73_v16  ;;  %403 = vmatpush3.msra.mxu1 %v185_v28 }
  0x3f   :  { %372 = vmatpush3.msra.mxu0 %v73_v16  ;;  %404 = vmatprep.subr.mxu1 %v184_v29 }
  0x40   :  { %373 = vmatprep.subr.mxu0 %v72_v17  ;;  %405 = vmatpush3.msra.mxu1 %v184_v29 }
  0x41   :  { %374 = vmatpush3.msra.mxu0 %v72_v17  ;;  %406 = vmatprep.subr.mxu1 %v183_v30 }
  0x42   :  { %375 = vmatprep.subr.mxu0 %v71_v18  ;;  %407 = vmatpush3.msra.mxu1 %v183_v30 }
  0x43   :  { %376 = vmatpush3.msra.mxu0 %v71_v18  ;;  %408 = vmatprep.subr.mxu1 %v182_v31 }
  0x44   :  { %377 = vmatprep.subr.mxu0 %v70_v19  ;;  %409 = vmatpush3.msra.mxu1 %v182_v31 }
  0x45   :  { %378 = vmatpush3.msra.mxu0 %v70_v19  ;;  %410 = vmatprep.subr.mxu1 %v181_v32 }
  0x46   :  { %380 = vmatmul.mubr.f32.vlgmr.msra.gmra.mxu0 %v69_v20  ;;  %411 = vmatpush3.msra.mxu1 %v181_v32 }
  0x47   :  { %412 = vmatprep.subr.mxu1 %v180_v33 }
  0x48   :  { %413 = vmatpush3.msra.mxu1 %v180_v33 }
 0x106   :  { %v381_v35 = vpop.f32.mrf.mxu0 }
 0x107   :  { %v165_v36 = vadd.f32 %v381_v35, %v309_v34 }
 0x108   :  { %v159_v37 = vpop.f32.mrf.mxu0 }
 0x109   :  { %v171_v38 = vmul.f32 0.70710677, %v165_v36  ;;  %v160_v39 = vadd.f32 %v309_v34, %v159_v37  ;;  %v169_v46 = vmul.f32 0.5, %v165_v36 }
 0x10b   :  { %423 = verf.f32 %v171_v38  ;;  %v170_v40 = vmul.f32 0.70710677, %v160_v39  ;;  %v168_v44 = vmul.f32 0.5, %v160_v39 }
 0x10d   :  { %425 = verf.f32 %v170_v40 }
 0x118   :  { %v424_v41 = vpop.eup %423 }
 0x119   :  { %v175_v43 = vadd.f32 1.0, %v424_v41 }
 0x11a   :  { %v426_v42 = vpop.eup %425 }
 0x11b   :  { %v174_v45 = vadd.f32 1.0, %v426_v42  ;;  %v177_v48 = vmul.f32 %v175_v43, %v169_v46 }
 0x11d   :  { %v176_v47 = vmul.f32 %v174_v45, %v168_v44 }
 0x11f   :  { %414 = vmatprep.mubr.f32.mxu1 %v176_v47 }
 0x120   :  { %415 = vmatmul.mubr.f32.vlgmr.msra.gmra.mxu1 %v177_v48 }
 0x1e0   :  { %v416_v50 = vpop.f32.mrf.mxu1 }
 0x1e1   :  { %v288_v51 = vadd.f32 %v416_v50, %v310_v49 }
 0x1e2   :  { %v262_v52 = vpop.f32.mrf.mxu1 }
 0x1e3   :  { %290 = vst [vmem:[#allocation9 + $0x8] sm:$0xff] %v288_v51  ;;  %v287_v53 = vadd.f32 %v310_v49, %v262_v52 }
 0x1e5   :  { %289 = vst [vmem:[#allocation9] sm:$0xff] %v287_v53 }
 0x1e6   :  { %498 = shalt.err (!%p495_p5)
}
 0x1e7   :  { %302 = dma.vmem_to_hbm [thread:$0]  %s297_s11, 256, %s584_s5, [#allocation5], %s515_s23, %s515_s23, %s516_s24  }
 0x1e8   :  { %511 = dma.done.wait [#allocation5], 256  }
 0x1e9   :  { %512 = vsyncadd [#allocation5], 4294967040 }
 0x1ea   :  { %306 = vsyncpa [#allocation4], 1 }
 0x1eb   :  { %307 = vsyncpa [#allocation7], 1 }
 0x1ec   :  { %308 = vsyncpa [#allocation5], 1 }

</bundles_post_ra>
